<compile_context>
chip_gen: v7x
topology: tpu7x:2x2x1
jax: 0.10.0
libtpu: 0.0.40
codegen_flags: <defaults>
</compile_context>

<pallas_src>
import functools
import math

import jax
import jax.numpy as jnp
from jax.experimental import pallas as pl
from jax.experimental.pallas import tpu as pltpu

_LANES = 128
_SUBLANES = 8
_VREG_ELEMS = _LANES * _SUBLANES   # 1024 elements = one f32 vreg
_MAX_LANES = 8 * _LANES            # up to 1024-wide lane-dense slab


def _round_up(x, m):
    return ((x + m - 1) // m) * m


def _default_block_bytes():
    # ~2 MiB per operand: 3 operands x 2 buffers x 2 MiB = 12 MiB, fits v5e's
    # 16 MiB default scoped VMEM and sits near the HBM roofline on all gens.
    # v7x (3.2 TB/s HBM, 2 TCs) amortizes per-step overhead better with 4 MiB
    # blocks and has the scoped-VMEM headroom for them.
    try:
        kind = jax.devices()[0].device_kind.lower()
    except Exception:  # defensive: no devices during import
        kind = ""
    if "v7" in kind:
        return 4 << 20
    return 2 << 20


_BLOCK_BYTES = _default_block_bytes()

_SMEM_SPEC = pl.BlockSpec(memory_space=pltpu.MemorySpace.SMEM)
_VMEM_SPEC = pl.BlockSpec(memory_space=pltpu.MemorySpace.VMEM)


def _mt_loss_both_kernel(lvc_ref, lvr_ref, lc_ref, lr_ref, out_ref):
    # log-variances from SMEM, lifted to (1, 1) so exp() runs on the vector
    # path (EUP) and splat-broadcasts against the lane-dense tile.
    lvc = jnp.full((1, 1), lvc_ref[0], jnp.float32)
    lvr = jnp.full((1, 1), lvr_ref[0], jnp.float32)
    out_ref[...] = (lc_ref[...] * jnp.exp(-lvc) + lvc
                    + lr_ref[...] * jnp.exp(-lvr) + lvr)


def _mt_loss_single_stream_kernel(sc_ref, lt_ref, out_ref):
    # sc_ref (SMEM, f32[3]):
    #   [0] log-variance of the streamed loss
    #   [1] log-variance of the scalar loss
    #   [2] scalar loss value
    lv_t = jnp.full((1, 1), sc_ref[0], jnp.float32)
    lv_s = jnp.full((1, 1), sc_ref[1], jnp.float32)
    ls = jnp.full((1, 1), sc_ref[2], jnp.float32)
    const = ls * jnp.exp(-lv_s) + lv_s + lv_t
    out_ref[...] = lt_ref[...] * jnp.exp(-lv_t) + const


def _pack_rows(flat, n, lanes):
    """Pack a length-n flat array lane-dense into (rows, lanes), rows % 8 == 0."""
    rows = _round_up(max(pl.cdiv(n, lanes), 1), _SUBLANES)
    pad = rows * lanes - n
    return jnp.pad(flat, (0, pad)).reshape(rows, lanes), rows


@functools.partial(jax.jit, static_argnames=("block_bytes",))
def multitask_loss(loss_cls, loss_rec, log_var_cls, log_var_rec,
                   *, block_bytes=None):
    """Pallas implementation of MultiTaskLoss.forward."""
    block_bytes = _BLOCK_BYTES if block_bytes is None else block_bytes

    loss_cls = jnp.asarray(loss_cls, jnp.float32)
    loss_rec = jnp.asarray(loss_rec, jnp.float32)
    lvc = jnp.asarray(log_var_cls, jnp.float32).reshape(1)
    lvr = jnp.asarray(log_var_rec, jnp.float32).reshape(1)

    # Torch broadcasting: the (1,)-shaped parameters participate too.
    out_shape = jnp.broadcast_shapes(loss_cls.shape, loss_rec.shape, (1,), (1,))
    n = math.prod(out_shape)

    # ---- Fast path: whole problem fits in one vreg (typical: scalar losses).
    if n <= _VREG_ELEMS:
        lc = jnp.broadcast_to(loss_cls, out_shape).reshape(-1)
        lr = jnp.broadcast_to(loss_rec, out_shape).reshape(-1)
        lc2, _ = _pack_rows(lc, n, _LANES)   # (8, 128)
        lr2, _ = _pack_rows(lr, n, _LANES)
        out = pl.pallas_call(
            _mt_loss_both_kernel,
            out_shape=jax.ShapeDtypeStruct((_SUBLANES, _LANES), jnp.float32),
            in_specs=[_SMEM_SPEC, _SMEM_SPEC, _VMEM_SPEC, _VMEM_SPEC],
            out_specs=_VMEM_SPEC,
        )(lvc, lvr, lc2, lr2)
        return out.reshape(-1)[:n].reshape(out_shape)

    # ---- Large path: lane-dense slab, tiled 1-D grid, partial last block OK.
    lanes = min(_MAX_LANES, _round_up(pl.cdiv(n, _SUBLANES), _LANES))
    tile_rows = max(_SUBLANES,
                    (block_bytes // (4 * lanes)) // _SUBLANES * _SUBLANES)

    cls_scalar = loss_cls.size == 1
    rec_scalar = loss_rec.size == 1    # not both scalar here (n > 1024)

    if cls_scalar or rec_scalar:
        # Stream only the tensor operand; scalar loss + both log-vars via SMEM.
        if cls_scalar:
            streamed, lv_stream = loss_rec, lvr
            scalar_loss, lv_scalar = loss_cls, lvc
        else:
            streamed, lv_stream = loss_cls, lvc
            scalar_loss, lv_scalar = loss_rec, lvr
        lt = jnp.broadcast_to(streamed, out_shape).reshape(-1)
        lt2, rows = _pack_rows(lt, n, lanes)
        tile_rows = min(tile_rows, rows)
        grid = (pl.cdiv(rows, tile_rows),)
        tile_spec = pl.BlockSpec((tile_rows, lanes), lambda i: (i, 0))
        scalars = jnp.concatenate([lv_stream, lv_scalar, scalar_loss.reshape(1)])
        out = pl.pallas_call(
            _mt_loss_single_stream_kernel,
            out_shape=jax.ShapeDtypeStruct((rows, lanes), jnp.float32),
            grid_spec=pltpu.PrefetchScalarGridSpec(
                num_scalar_prefetch=0,
                grid=grid,
                in_specs=[_SMEM_SPEC, tile_spec],
                out_specs=tile_spec,
            ),
            compiler_params=pltpu.CompilerParams(
                dimension_semantics=("parallel",)),
        )(scalars, lt2)
    else:
        lc = jnp.broadcast_to(loss_cls, out_shape).reshape(-1)
        lr = jnp.broadcast_to(loss_rec, out_shape).reshape(-1)
        lc2, rows = _pack_rows(lc, n, lanes)
        lr2, _ = _pack_rows(lr, n, lanes)
        tile_rows = min(tile_rows, rows)
        grid = (pl.cdiv(rows, tile_rows),)
        tile_spec = pl.BlockSpec((tile_rows, lanes), lambda i: (i, 0))
        out = pl.pallas_call(
            _mt_loss_both_kernel,
            out_shape=jax.ShapeDtypeStruct((rows, lanes), jnp.float32),
            grid_spec=pltpu.PrefetchScalarGridSpec(
                num_scalar_prefetch=0,
                grid=grid,
                in_specs=[_SMEM_SPEC, _SMEM_SPEC, tile_spec, tile_spec],
                out_specs=tile_spec,
            ),
            compiler_params=pltpu.CompilerParams(
                dimension_semantics=("parallel",)),
        )(lvc, lvr, lc2, lr2)

    return out.reshape(-1)[:n].reshape(out_shape)


def multitask_loss_reference(loss_cls, loss_rec, log_var_cls, log_var_rec):
    lc = loss_cls * jnp.exp(-log_var_cls) + log_var_cls
    lr = loss_rec * jnp.exp(-log_var_rec) + log_var_rec
    return lc + lr


if __name__ == "__main__":
    key = jax.random.PRNGKey(0)
    k1, k2, k3, k4, k5, k6, k7, k8 = jax.random.split(key, 8)

    # Case 1: scalar losses with freshly initialized parameters (log_var = 0),
    # exactly like MultiTaskLoss() right after construction.  -> fast path
    loss_cls = jnp.abs(jax.random.normal(k1, (), jnp.float32)) + 0.1
    loss_rec = jnp.abs(jax.random.normal(k2, (), jnp.float32)) + 0.1
    lv0 = jnp.zeros((1,), jnp.float32)
    out1 = jax.block_until_ready(multitask_loss(loss_cls, loss_rec, lv0, lv0))
    ref1 = multitask_loss_reference(loss_cls, loss_rec, lv0, lv0)
    assert out1.shape == ref1.shape == (1,)
    assert jnp.allclose(out1, ref1, atol=1e-5, rtol=1e-5), "case 1 (scalar) mismatch"

    # Case 2: small batched per-sample losses, trained log-variances. -> fast path
    lc_s = jnp.abs(jax.random.normal(k3, (2, 16), jnp.float32))
    lr_s = jnp.abs(jax.random.normal(k4, (2, 16), jnp.float32))
    lvc_t = jnp.array([0.3], jnp.float32)
    lvr_t = jnp.array([-0.2], jnp.float32)
    out2 = jax.block_until_ready(multitask_loss(lc_s, lr_s, lvc_t, lvr_t))
    ref2 = multitask_loss_reference(lc_s, lr_s, lvc_t, lvr_t)
    assert out2.shape == ref2.shape == (2, 16)
    assert jnp.allclose(out2, ref2, atol=1e-5, rtol=1e-5), "case 2 (small batch) mismatch"

    # Case 3: per-element classification loss tensor + scalar reconstruction
    # loss -> big path, single streamed operand (scalar loss rides in SMEM).
    lc_b = jnp.abs(jax.random.normal(k5, (8, 1024), jnp.float32))
    lr_b = jnp.abs(jax.random.normal(k6, (), jnp.float32)) + 0.1
    out3 = jax.block_until_ready(multitask_loss(lc_b, lr_b, lvc_t, lvr_t))
    ref3 = multitask_loss_reference(lc_b, lr_b, lvc_t, lvr_t)
    assert out3.shape == ref3.shape == (8, 1024)
    assert jnp.allclose(out3, ref3, atol=1e-5, rtol=1e-5), "case 3 (single-stream) mismatch"

    # Case 4: two full loss tensors with a small forced block size so the grid
    # has a ragged (partial) last block -> exercises the cdiv-based tiling.
    lc_r = jnp.abs(jax.random.normal(k7, (24, 1024), jnp.float32))
    lr_r = jnp.abs(jax.random.normal(k8, (24, 1024), jnp.float32))
    out4 = jax.block_until_ready(
        multitask_loss(lc_r, lr_r, lvc_t, lvr_t, block_bytes=64 * 1024))
    ref4 = multitask_loss_reference(lc_r, lr_r, lvc_t, lvr_t)
    assert out4.shape == ref4.shape == (24, 1024)
    assert jnp.allclose(out4, ref4, atol=1e-5, rtol=1e-5), "case 4 (ragged grid) mismatch"

    print("KERNEL_OK")
</pallas_src>

<mosaic_0001>
module attributes {stable_mosaic.version = 11 : i64} {
  func.func @_mt_loss_both_kernel(%arg0: memref<1xf32, #tpu.memory_space<smem>>, %arg1: memref<1xf32, #tpu.memory_space<smem>>, %arg2: memref<8x128xf32, #tpu.memory_space<vmem>>, %arg3: memref<8x128xf32, #tpu.memory_space<vmem>>, %arg4: memref<8x128xf32, #tpu.memory_space<vmem>>) attributes {dimension_semantics = [], scalar_prefetch = 0 : i64, scratch_operands = 0 : i64, tpu.core_type = #tpu.core_type<tc>} {
    %c0 = arith.constant 0 : index
    %0 = memref.load %arg0[%c0] : memref<1xf32, #tpu.memory_space<smem>>
    %1 = vector.broadcast %0 : f32 to vector<1x1xf32>
    %c0_0 = arith.constant 0 : index
    %2 = memref.load %arg1[%c0_0] : memref<1xf32, #tpu.memory_space<smem>>
    %3 = vector.broadcast %2 : f32 to vector<1x1xf32>
    %c0_1 = arith.constant 0 : index
    %c0_2 = arith.constant 0 : index
    %4 = vector.load %arg2[%c0_1, %c0_2] : memref<8x128xf32, #tpu.memory_space<vmem>>, vector<8x128xf32>
    %cst = arith.constant 0.000000e+00 : f32
    %5 = vector.broadcast %cst : f32 to vector<1x1xf32>
    %6 = arith.subf %5, %1 : vector<1x1xf32>
    %7 = math.exp %6 : vector<1x1xf32>
    %8 = vector.broadcast %7 : vector<1x1xf32> to vector<8x128xf32>
    %9 = arith.mulf %4, %8 : vector<8x128xf32>
    %10 = vector.broadcast %1 : vector<1x1xf32> to vector<8x128xf32>
    %11 = arith.addf %9, %10 : vector<8x128xf32>
    %c0_3 = arith.constant 0 : index
    %c0_4 = arith.constant 0 : index
    %12 = vector.load %arg3[%c0_3, %c0_4] : memref<8x128xf32, #tpu.memory_space<vmem>>, vector<8x128xf32>
    %cst_5 = arith.constant 0.000000e+00 : f32
    %13 = vector.broadcast %cst_5 : f32 to vector<1x1xf32>
    %14 = arith.subf %13, %3 : vector<1x1xf32>
    %15 = math.exp %14 : vector<1x1xf32>
    %16 = vector.broadcast %15 : vector<1x1xf32> to vector<8x128xf32>
    %17 = arith.mulf %12, %16 : vector<8x128xf32>
    %18 = arith.addf %11, %17 : vector<8x128xf32>
    %19 = vector.broadcast %3 : vector<1x1xf32> to vector<8x128xf32>
    %20 = arith.addf %18, %19 : vector<8x128xf32>
    %c0_6 = arith.constant 0 : index
    %c0_7 = arith.constant 0 : index
    %21 = vector.load %arg4[%c0_6, %c0_7] : memref<8x128xf32, #tpu.memory_space<vmem>>, vector<8x128xf32>
    tpu.vector_store %arg4[%c0_6, %c0_7], %20 {strides = array<i32>} : memref<8x128xf32, #tpu.memory_space<vmem>>, vector<8x128xf32>,
    return
  }
}

</mosaic_0001>

<bundles_post_ra>
// kernel: multitask_loss.1
= control target key start
LH: loop header
LB: loop body
LE: loop exit
PB: predicated region body
PF: predicated region fallthrough
CT: control target
= control target key end

     0   :  { %s85_s0 = inlined_call_operand.<no memory space> [shape: f32[1], index: 0, kind: input, shape index: {}]   ;;  %s86_s1 = inlined_call_operand.<no memory space> [shape: f32[1], index: 1, kind: input, shape index: {}]   ;;  %s87_s2 = inlined_call_operand.vmem [shape: f32[8,128], index: 2, kind: input, shape index: {}]   ;;  %s88_s3 = inlined_call_operand.vmem [shape: f32[8,128], index: 3, kind: input, shape index: {}]   ;;  %s89_s4 = inlined_call_operand.vmem [shape: f32[8,128], index: 4, kind: output, shape index: {}]  }
   0x1   :  { %v20_v0 = vstv %s85_s0  ;;  %v22_v1 = vstv %s86_s1  ;;  %v23_v6 = vld [vmem:[%s87_s2] sm:$0xff] }
   0x2   :  { %v24_v2 = vsub.f32 0.0, %v20_v0  ;;  %v30_v3 = vsub.f32 0.0, %v22_v1  ;;  %v29_v7 = vld [vmem:[%s88_s3] sm:$0xff] }
   0x4   :  { %v25_v4 = vmul.f32 1.442695, %v24_v2  ;;  %v31_v5 = vmul.f32 1.442695, %v30_v3 }
   0x6   :  { %41 = vpow2.f32 %v25_v4 }
   0x7   :  { %43 = vpow2.f32 %v31_v5 }
  0x10   :  { %v42_v8 = vpop.eup %41 }
  0x11   :  { %v44_v9 = vpop.eup %43  ;;  %v27_v10 = vmul.f32 %v42_v8, %v23_v6 }
  0x12   :  { %v33_v11 = vmul.f32 %v44_v9, %v29_v7 }
  0x13   :  { %v28_v12 = vadd.f32 %v27_v10, %v20_v0 }
  0x15   :  { %v34_v13 = vadd.f32 %v33_v11, %v28_v12 }
  0x17   :  { %v35_v14 = vadd.f32 %v34_v13, %v22_v1 }
  0x19   :  { %36 = vst [vmem:[%s89_s4] sm:$0xff] %v35_v14 }

</bundles_post_ra>
